<compile_context>
chip_gen: v7x
topology: tpu7x:2x2x1
jax: 0.10.0
libtpu: 0.0.40
codegen_flags: <defaults>
</compile_context>

<pallas_src>
import functools

import jax
import jax.numpy as jnp
from jax.experimental import pallas as pl
from jax.experimental.pallas import tpu as pltpu


def _round_up(x, m):
    return (x + m - 1) // m * m


def _make_critic_kernel(n_hidden):
    """Fused MLP kernel: split-W1 first layer, n_hidden ReLU layers, dim-1 out."""
    n_extra = n_hidden - 1  # hidden layers after the first one

    def kernel(*refs):
        obs_ref, act_ref, w1o_ref, w1a_ref, b1_ref = refs[:5]
        hid_refs = refs[5:5 + 2 * n_extra]
        wout_ref, bout_ref, o_ref = refs[5 + 2 * n_extra:]

        # Layer 1: fused concat via split W1 (two MXU matmuls, f32 accumulate).
        h = jnp.dot(obs_ref[...], w1o_ref[...],
                    preferred_element_type=jnp.float32)
        h = h + jnp.dot(act_ref[...], w1a_ref[...],
                        preferred_element_type=jnp.float32)
        h = jnp.maximum(h + b1_ref[...], 0.0)          # bias + ReLU in f32

        # Remaining hidden layers (all f32; MXU is nowhere near the bottleneck).
        for li in range(n_extra):
            w_ref = hid_refs[2 * li]
            b_ref = hid_refs[2 * li + 1]
            h = jnp.dot(h, w_ref[...], preferred_element_type=jnp.float32)
            h = jnp.maximum(h + b_ref[...], 0.0)

        # Final Linear(H_last -> 1), emitted lane-dense as a (1, tb) row:
        # (1, H) contracted with (tb, H) over H  ->  (1, tb).
        out = jax.lax.dot_general(
            wout_ref[...], h,
            dimension_numbers=(((1,), (1,)), ((), ())),
            preferred_element_type=jnp.float32)
        out = out + bout_ref[0, 0]                     # scalar bias from SMEM
        o_ref[...] = out.reshape(o_ref.shape).astype(o_ref.dtype)

    return kernel


@functools.partial(jax.jit, static_argnames=("block_batch",))
def critic_forward(observations, actions, params, *, block_batch=2048):
    """Pallas-backed forward pass of Critic.

    observations: (B, input_dim)
    actions:      (B, action_dim)
    params:       (w1, b1, w2, b2, ..., w_out, b_out) with w_i (in, out),
                  b_i (1, out) — i.e. torch Linear weights transposed.
    returns:      (B,) float32
    """
    obs = observations
    act = actions
    B = obs.shape[0]
    d_obs = obs.shape[-1]
    d_act = act.shape[-1]

    n_layers = len(params) // 2          # total number of Linear layers
    n_hidden = n_layers - 1
    ws = [params[2 * i] for i in range(n_layers)]
    bs = [params[2 * i + 1] for i in range(n_layers)]
    assert ws[-1].shape[1] == 1, "Critic's final Linear must have out_features == 1"

    # Split W1 so the concatenated (B, Din) activation never hits HBM.  The
    # (tiny, VMEM-resident) W1 halves are cast to the activation dtype so a
    # caller that stores obs/act in bf16 gets a bf16 first-layer MXU path
    # without any wrapper-side re-cast pass over the activations.
    w1o = ws[0][:d_obs].astype(obs.dtype)
    w1a = ws[0][d_obs:].astype(act.dtype)
    b1 = bs[0].astype(jnp.float32)
    hidden_ws = [w.astype(jnp.float32) for w in ws[1:-1]]
    hidden_bs = [b.astype(jnp.float32) for b in bs[1:-1]]
    w_out = ws[-1].reshape(1, -1).astype(jnp.float32)   # (1, H_last)
    b_out = bs[-1].reshape(1, 1).astype(jnp.float32)    # scalar -> SMEM

    # Batch tiling: large sublane-aligned tiles (mem-bound kernel).  Ensure at
    # least 2 grid steps when the batch allows it so both v7x TensorCores get
    # work under dimension_semantics=("parallel",).
    b8 = _round_up(B, 8)
    tb = min(_round_up(block_batch, 8), b8)
    if tb >= b8 and b8 >= 16:
        tb = _round_up(b8 // 2, 8)
    b_pad = _round_up(B, tb)
    if b_pad != B:
        obs = jnp.pad(obs, ((0, b_pad - B), (0, 0)))
        act = jnp.pad(act, ((0, b_pad - B), (0, 0)))
    grid_n = b_pad // tb

    # Constant-index BlockSpec: block == full array, DMA'd once, stays resident.
    def const(a):
        return pl.BlockSpec(a.shape, lambda i, _nd=a.ndim: (0,) * _nd)

    in_specs = [
        pl.BlockSpec((tb, d_obs), lambda i: (i, 0)),
        pl.BlockSpec((tb, d_act), lambda i: (i, 0)),
        const(w1o), const(w1a), const(b1),
    ]
    operands = [obs, act, w1o, w1a, b1]
    for w, b in zip(hidden_ws, hidden_bs):
        in_specs += [const(w), const(b)]
        operands += [w, b]
    in_specs += [const(w_out),
                 pl.BlockSpec(memory_space=pltpu.MemorySpace.SMEM)]
    operands += [w_out, b_out]

    # Lane-dense output: one (1, tb) row per grid step.
    out_shape = jax.ShapeDtypeStruct((grid_n, 1, tb), jnp.float32)
    out_specs = pl.BlockSpec((1, 1, tb), lambda i: (i, 0, 0))

    # VMEM budget: obs/act tiles are lane-padded to 128 and double-buffered,
    # plus a few f32 activation intermediates -> conservatively ~4 KiB/row.
    # Only raise the scoped-VMEM limit when a big tile needs it (cap at
    # 48 MiB: safe on v7x's 64 MiB physical, trivially safe on v5e/v6e).
    est_vmem = tb * 128 * 4 * 8 + (2 << 20)
    vmem_limit = min(est_vmem, 48 << 20) if est_vmem > (16 << 20) else None

    # Advisory cost estimate for XLA's scheduler.
    dims = [d_obs + d_act] + [w.shape[1] for w in ws[:-1]] + [1]
    flops = 2 * b_pad * sum(dims[i] * dims[i + 1] for i in range(len(dims) - 1))
    bytes_accessed = (sum(int(o.size) * o.dtype.itemsize for o in operands)
                      + b_pad * 4)

    out = pl.pallas_call(
        _make_critic_kernel(n_hidden),
        out_shape=out_shape,
        grid=(grid_n,),
        in_specs=in_specs,
        out_specs=out_specs,
        compiler_params=pltpu.CompilerParams(
            dimension_semantics=("parallel",),
            vmem_limit_bytes=vmem_limit),
        cost_estimate=pl.CostEstimate(flops=flops, transcendentals=0,
                                      bytes_accessed=bytes_accessed),
    )(*operands)
    return out.reshape(-1)[:B]    # drop padding + squeeze(-1)


def init_critic_params(key, input_dim, action_dim, hidden_dims):
    """Deterministic init mimicking nn.Linear default (U[-1/sqrt(fan_in), ..])."""
    dims = [input_dim + action_dim] + list(hidden_dims) + [1]
    params = []
    for i in range(len(dims) - 1):
        fan_in, fan_out = dims[i], dims[i + 1]
        key, kw, kb = jax.random.split(key, 3)
        bound = 1.0 / jnp.sqrt(jnp.float32(fan_in))
        # Stored transposed relative to torch (in, out) so the kernel does x @ W.
        w = jax.random.uniform(kw, (fan_in, fan_out), jnp.float32, -bound, bound)
        b = jax.random.uniform(kb, (1, fan_out), jnp.float32, -bound, bound)
        params += [w, b]
    return tuple(params)


def _reference_forward(observations, actions, params):
    x = jnp.concatenate([observations.astype(jnp.float32),
                         actions.astype(jnp.float32)], axis=-1)
    n_layers = len(params) // 2
    h = x
    for i in range(n_layers - 1):
        h = jnp.maximum(h @ params[2 * i] + params[2 * i + 1], 0.0)
    return (h @ params[-2] + params[-1])[:, 0]


if __name__ == "__main__":
    input_dim, action_dim = 16, 8
    hidden_dims = (32, 32)
    batch = 8

    key = jax.random.PRNGKey(0)
    k_obs, k_act, k_params = jax.random.split(key, 3)

    observations = jax.random.normal(k_obs, (batch, input_dim), jnp.float32)
    actions = jax.random.normal(k_act, (batch, action_dim), jnp.float32)
    params = init_critic_params(k_params, input_dim, action_dim, hidden_dims)
    q_ref = _reference_forward(observations, actions, params)

    # 1) f32 path, tiny batch (single grid step): exact vs the torch-equivalent ref.
    q = jax.block_until_ready(critic_forward(observations, actions, params))
    assert q.shape == (batch,)
    assert jnp.allclose(q, q_ref, atol=1e-4, rtol=1e-4)

    # 2) Non-multiple batch + small block -> padding and a multi-step batch grid.
    batch2 = 300
    k_obs2, k_act2 = jax.random.split(jax.random.PRNGKey(1))
    obs2 = jax.random.normal(k_obs2, (batch2, input_dim), jnp.float32)
    act2 = jax.random.normal(k_act2, (batch2, action_dim), jnp.float32)
    q2_ref = _reference_forward(obs2, act2, params)
    q2 = jax.block_until_ready(
        critic_forward(obs2, act2, params, block_batch=128))
    assert q2.shape == (batch2,)
    assert jnp.allclose(q2, q2_ref, atol=1e-4, rtol=1e-4)

    # 3) Upstream-bf16 storage path: activations arrive already in bf16, so the
    #    kernel DMAs half the bytes (no wrapper-side re-cast pass over HBM).
    q_bf16 = jax.block_until_ready(
        critic_forward(obs2.astype(jnp.bfloat16), act2.astype(jnp.bfloat16),
                       params))
    assert q_bf16.shape == (batch2,)
    assert jnp.allclose(q_bf16, q2_ref, atol=5e-2, rtol=5e-2)

    print("KERNEL_OK")
</pallas_src>

<mosaic_0001>
module attributes {stable_mosaic.version = 11 : i64} {
  func.func @kernel(%arg0: i32, %arg1: memref<8x16xf32, #tpu.memory_space<vmem>>, %arg2: memref<8x8xf32, #tpu.memory_space<vmem>>, %arg3: memref<16x32xf32, #tpu.memory_space<vmem>>, %arg4: memref<8x32xf32, #tpu.memory_space<vmem>>, %arg5: memref<1x32xf32, #tpu.memory_space<vmem>>, %arg6: memref<32x32xf32, #tpu.memory_space<vmem>>, %arg7: memref<1x32xf32, #tpu.memory_space<vmem>>, %arg8: memref<1x32xf32, #tpu.memory_space<vmem>>, %arg9: memref<1x1xf32, #tpu.memory_space<smem>>, %arg10: memref<1x1x8xf32, #tpu.memory_space<vmem>>) attributes {dimension_semantics = [#tpu.dimension_semantics<parallel>], iteration_bounds = array<i64: 1>, scalar_prefetch = 0 : i64, scratch_operands = 0 : i64, tpu.core_type = #tpu.core_type<tc>, window_params = [{transform_indices = @transform_0, window_bounds = array<i64: 8, 16>}, {transform_indices = @transform_1, window_bounds = array<i64: 8, 8>}, {pipeline_mode = #tpu.pipeline_mode<synchronous>, transform_indices = @transform_2, window_bounds = array<i64: 16, 32>}, {pipeline_mode = #tpu.pipeline_mode<synchronous>, transform_indices = @transform_3, window_bounds = array<i64: 8, 32>}, {pipeline_mode = #tpu.pipeline_mode<synchronous>, transform_indices = @transform_4, window_bounds = array<i64: 1, 32>}, {pipeline_mode = #tpu.pipeline_mode<synchronous>, transform_indices = @transform_5, window_bounds = array<i64: 32, 32>}, {pipeline_mode = #tpu.pipeline_mode<synchronous>, transform_indices = @transform_6, window_bounds = array<i64: 1, 32>}, {pipeline_mode = #tpu.pipeline_mode<synchronous>, transform_indices = @transform_7, window_bounds = array<i64: 1, 32>}, {transform_indices = @transform_8, window_bounds = array<i64: 1, 1>}, {transform_indices = @transform_9, window_bounds = array<i64: 1, 1, 8>}]} {
    %c0 = arith.constant 0 : index
    %c0_0 = arith.constant 0 : index
    %0 = vector.load %arg1[%c0, %c0_0] : memref<8x16xf32, #tpu.memory_space<vmem>>, vector<8x16xf32>
    %c0_1 = arith.constant 0 : index
    %c0_2 = arith.constant 0 : index
    %1 = vector.load %arg3[%c0_1, %c0_2] : memref<16x32xf32, #tpu.memory_space<vmem>>, vector<16x32xf32>
    %cst = arith.constant dense<0.000000e+00> : vector<8x32xf32>
    %2 = tpu.matmul %0, %1, %cst {dimension_numbers = #tpu.dot_dimension_numbers<[1], [0], [0], [1], [0, 0, 1, 1], [], []>} : vector<8x16xf32>, vector<16x32xf32>, vector<8x32xf32> -> vector<8x32xf32>
    %c0_3 = arith.constant 0 : index
    %c0_4 = arith.constant 0 : index
    %3 = vector.load %arg2[%c0_3, %c0_4] : memref<8x8xf32, #tpu.memory_space<vmem>>, vector<8x8xf32>
    %c0_5 = arith.constant 0 : index
    %c0_6 = arith.constant 0 : index
    %4 = vector.load %arg4[%c0_5, %c0_6] : memref<8x32xf32, #tpu.memory_space<vmem>>, vector<8x32xf32>
    %cst_7 = arith.constant dense<0.000000e+00> : vector<8x32xf32>
    %5 = tpu.matmul %3, %4, %cst_7 {dimension_numbers = #tpu.dot_dimension_numbers<[1], [0], [0], [1], [0, 0, 1, 1], [], []>} : vector<8x8xf32>, vector<8x32xf32>, vector<8x32xf32> -> vector<8x32xf32>
    %6 = arith.addf %2, %5 : vector<8x32xf32>
    %c0_8 = arith.constant 0 : index
    %c0_9 = arith.constant 0 : index
    %7 = vector.load %arg5[%c0_8, %c0_9] : memref<1x32xf32, #tpu.memory_space<vmem>>, vector<1x32xf32>
    %8 = vector.broadcast %7 : vector<1x32xf32> to vector<8x32xf32>
    %9 = arith.addf %6, %8 : vector<8x32xf32>
    %cst_10 = arith.constant 0.000000e+00 : f32
    %10 = vector.broadcast %cst_10 : f32 to vector<8x32xf32>
    %11 = arith.maximumf %9, %10 : vector<8x32xf32>
    %c0_11 = arith.constant 0 : index
    %c0_12 = arith.constant 0 : index
    %12 = vector.load %arg6[%c0_11, %c0_12] : memref<32x32xf32, #tpu.memory_space<vmem>>, vector<32x32xf32>
    %cst_13 = arith.constant dense<0.000000e+00> : vector<8x32xf32>
    %13 = tpu.matmul %11, %12, %cst_13 {dimension_numbers = #tpu.dot_dimension_numbers<[1], [0], [0], [1], [0, 0, 1, 1], [], []>} : vector<8x32xf32>, vector<32x32xf32>, vector<8x32xf32> -> vector<8x32xf32>
    %c0_14 = arith.constant 0 : index
    %c0_15 = arith.constant 0 : index
    %14 = vector.load %arg7[%c0_14, %c0_15] : memref<1x32xf32, #tpu.memory_space<vmem>>, vector<1x32xf32>
    %15 = vector.broadcast %14 : vector<1x32xf32> to vector<8x32xf32>
    %16 = arith.addf %13, %15 : vector<8x32xf32>
    %cst_16 = arith.constant 0.000000e+00 : f32
    %17 = vector.broadcast %cst_16 : f32 to vector<8x32xf32>
    %18 = arith.maximumf %16, %17 : vector<8x32xf32>
    %c0_17 = arith.constant 0 : index
    %c0_18 = arith.constant 0 : index
    %19 = vector.load %arg8[%c0_17, %c0_18] : memref<1x32xf32, #tpu.memory_space<vmem>>, vector<1x32xf32>
    %cst_19 = arith.constant dense<0.000000e+00> : vector<1x8xf32>
    %20 = tpu.matmul %19, %18, %cst_19 {dimension_numbers = #tpu.dot_dimension_numbers<[1], [1], [0], [0], [0, 0, 1, 0], [], []>} : vector<1x32xf32>, vector<8x32xf32>, vector<1x8xf32> -> vector<1x8xf32>
    %c0_20 = arith.constant 0 : index
    %c0_21 = arith.constant 0 : index
    %21 = memref.load %arg9[%c0_20, %c0_21] : memref<1x1xf32, #tpu.memory_space<smem>>
    %22 = vector.broadcast %21 : f32 to vector<1x8xf32>
    %23 = arith.addf %20, %22 : vector<1x8xf32>
    %24 = vector.shape_cast %23 : vector<1x8xf32> to vector<1x1x8xf32>
    %c0_22 = arith.constant 0 : index
    %c0_23 = arith.constant 0 : index
    %c0_24 = arith.constant 0 : index
    %25 = vector.load %arg10[%c0_22, %c0_23, %c0_24] : memref<1x1x8xf32, #tpu.memory_space<vmem>>, vector<1x1x8xf32>
    tpu.vector_store %arg10[%c0_22, %c0_23, %c0_24], %24 {strides = array<i32>} : memref<1x1x8xf32, #tpu.memory_space<vmem>>, vector<1x1x8xf32>,
    return
  }
  func.func @transform_0(%arg0: i32) -> (i32, i32) {
    %c0_i32 = arith.constant 0 : i32
    %c0_i32_0 = arith.constant 0 : i32
    return %arg0, %c0_i32 : i32, i32
  }
  func.func @transform_1(%arg0: i32) -> (i32, i32) {
    %c0_i32 = arith.constant 0 : i32
    %c0_i32_0 = arith.constant 0 : i32
    return %arg0, %c0_i32 : i32, i32
  }
  func.func @transform_2(%arg0: i32) -> (i32, i32) {
    %c0_i32 = arith.constant 0 : i32
    %c0_i32_0 = arith.constant 0 : i32
    %c0_i32_1 = arith.constant 0 : i32
    return %c0_i32, %c0_i32_0 : i32, i32
  }
  func.func @transform_3(%arg0: i32) -> (i32, i32) {
    %c0_i32 = arith.constant 0 : i32
    %c0_i32_0 = arith.constant 0 : i32
    %c0_i32_1 = arith.constant 0 : i32
    return %c0_i32, %c0_i32_0 : i32, i32
  }
  func.func @transform_4(%arg0: i32) -> (i32, i32) {
    %c0_i32 = arith.constant 0 : i32
    %c0_i32_0 = arith.constant 0 : i32
    %c0_i32_1 = arith.constant 0 : i32
    return %c0_i32, %c0_i32_0 : i32, i32
  }
  func.func @transform_5(%arg0: i32) -> (i32, i32) {
    %c0_i32 = arith.constant 0 : i32
    %c0_i32_0 = arith.constant 0 : i32
    %c0_i32_1 = arith.constant 0 : i32
    return %c0_i32, %c0_i32_0 : i32, i32
  }
  func.func @transform_6(%arg0: i32) -> (i32, i32) {
    %c0_i32 = arith.constant 0 : i32
    %c0_i32_0 = arith.constant 0 : i32
    %c0_i32_1 = arith.constant 0 : i32
    return %c0_i32, %c0_i32_0 : i32, i32
  }
  func.func @transform_7(%arg0: i32) -> (i32, i32) {
    %c0_i32 = arith.constant 0 : i32
    %c0_i32_0 = arith.constant 0 : i32
    %c0_i32_1 = arith.constant 0 : i32
    return %c0_i32, %c0_i32_0 : i32, i32
  }
  func.func @transform_8(%arg0: i32) -> (i32, i32) {
    %c0_i32 = arith.constant 0 : i32
    %c0_i32_0 = arith.constant 0 : i32
    %c0_i32_1 = arith.constant 0 : i32
    return %c0_i32, %c0_i32_0 : i32, i32
  }
  func.func @transform_9(%arg0: i32) -> (i32, i32, i32) {
    %c0_i32 = arith.constant 0 : i32
    %c0_i32_0 = arith.constant 0 : i32
    %c0_i32_1 = arith.constant 0 : i32
    return %arg0, %c0_i32, %c0_i32_0 : i32, i32, i32
  }
}

</mosaic_0001>

<bundles_post_ra>
// kernel: critic_forward.1
= control target key start
LH: loop header
LB: loop body
LE: loop exit
PB: predicated region body
PF: predicated region fallthrough
CT: control target
= control target key end

     0   :  { %15 = vsyncpa [#allocation4], 0  ;;  %s666_s0 = inlined_call_operand.hbm [shape: f32[8,16], index: 0, kind: input, shape index: {}]   ;;  %s667_s1 = inlined_call_operand.hbm [shape: f32[8,8], index: 1, kind: input, shape index: {}]   ;;  %s668_s2 = inlined_call_operand.vmem [shape: f32[16,32], index: 2, kind: input, shape index: {}]   ;;  %s669_s3 = inlined_call_operand.vmem [shape: f32[8,32], index: 3, kind: input, shape index: {}]   ;;  %s670_s4 = inlined_call_operand.vmem [shape: f32[1,32], index: 4, kind: input, shape index: {}]   ;;  %s671_s5 = inlined_call_operand.vmem [shape: f32[32,32], index: 5, kind: input, shape index: {}]   ;;  %s672_s6 = inlined_call_operand.vmem [shape: f32[1,32], index: 6, kind: input, shape index: {}]   ;;  %s673_s7 = inlined_call_operand.vmem [shape: f32[1,32], index: 7, kind: input, shape index: {}]   ;;  %s674_s8 = inlined_call_operand.<no memory space> [shape: f32[1,1], index: 8, kind: input, shape index: {}]   ;;  %s675_s9 = inlined_call_operand.hbm [shape: f32[1,1,8], index: 9, kind: output, shape index: {}]  }
   0x1   :  { %16 = vsyncpa [#allocation7], 0 }
   0x2   :  { %17 = vsyncpa [#allocation5], 0  ;;  %s537_s30 = smov [#allocation3]   ;;  %s538_s11 = smov [#allocation6]  }
   0x3   :  { %s24_s10 = sshll.u32 %s537_s30, 4  ;;  %s34_s12 = sshll.u32 %s538_s11, 4  ;;  %s25_s10 = int_to_ptr.vmem [resolvable:$true] %s24_s10  ;;  %s35_s12 = int_to_ptr.vmem [resolvable:$true] %s34_s12 }
   0x4   :  { %s465_s15 = scalar_lea.hbm %s666_s0, 128 }
   0x5   :  { %p466_p0 = scmp.ne.s32.totalorder %s666_s0, %s465_s15  ;;  %p469_p1 = scmp.lt.u32.totalorder %s465_s15, %s666_s0 }
   0x7   :  { %p471_p2 = pnand %p469_p1, %p466_p0 }
   0x9   :  { %474 = shalt.err (!%p471_p2)
}
   0xa   :  { %s475_s20 = scalar_lea.vmem %s25_s10, 128  ;;  %p480_p4 = scmp.lt.s32.totalorder %s25_s10, %s25_s10 }
   0xb   :  { %p476_p3 = scmp.ne.s32.totalorder %s25_s10, %s475_s20  ;;  %p481_p5 = scmp.lt.s32.totalorder %s475_s20, %s475_s20 }
   0xd   :  { %p482_p6 = por %p481_p5, %p480_p4 }
   0xf   :  { %p483_p7 = pnand %p482_p6, %p476_p3 }
  0x11   :  { %486 = shalt.err (!%p483_p7)
}
  0x12   :  { %27 = dma.hbm_to_vmem [thread:$0]  %s666_s0, 128, %s25_s10, [#allocation4]  }
  0x13   :  { %s487_s25 = scalar_lea.hbm %s667_s1, 128 }
  0x14   :  { %p488_p8 = scmp.ne.s32.totalorder %s667_s1, %s487_s25  ;;  %p491_p9 = scmp.lt.u32.totalorder %s487_s25, %s667_s1 }
  0x16   :  { %p493_p10 = pnand %p491_p9, %p488_p8 }
  0x18   :  { %496 = shalt.err (!%p493_p10)
}
  0x19   :  { %s497_s30 = scalar_lea.vmem %s35_s12, 128  ;;  %p502_p12 = scmp.lt.s32.totalorder %s35_s12, %s35_s12 }
  0x1a   :  { %p498_p11 = scmp.ne.s32.totalorder %s35_s12, %s497_s30  ;;  %p503_p13 = scmp.lt.s32.totalorder %s497_s30, %s497_s30 }
  0x1c   :  { %p504_p0 = por %p503_p13, %p502_p12 }
  0x1e   :  { %p505_p1 = pnand %p504_p0, %p498_p11 }
  0x20   :  { %508 = shalt.err (!%p505_p1)
}
  0x21   :  { %37 = dma.hbm_to_vmem [thread:$0]  %s667_s1, 128, %s35_s12, [#allocation7]  }
  0x22   :  { %531 = dma.done.wait [#allocation4], 128  }
  0x23   :  { %532 = vsyncadd [#allocation4], 4294967168 }
  0x24   :  { %533 = dma.done.wait [#allocation7], 128  }
  0x25   :  { %534 = vsyncadd [#allocation7], 4294967168  ;;  %v539_v0 = vmov 0.0|0.0   ;;  %v540_v1 = vmov 0.0   ;;  %vm541_vm0 = vmmov 0   ;;  %vm63_vm1 = vcmask 64512  }
  0x26   :  { %450 = vmatprep.subr.bf16.mxu1 %v539_v0  ;;  %422 = vmatprep.subr.mxu0 %v540_v1  ;;  %v59_v2 = vld [vmem:[%s668_s2] sm:$0xff]  ;;  %v60_v3 = vld [vmem:[%s668_s2 + $0x8] sm:$0xff]  ;;  %vm137_vm2 = vcmask 130048   ;;  %v222_v11 = vld [vmem:[%s671_s5 + $0x10] sm:$0xff]  ;;  %vm231_vm3 = vcmask 261120   ;;  %v308_v28 = vstv %s674_s8  ;;  %s542_s28 = smov [#allocation8]  }
  0x27   :  { %424 = vmatprep.mubr.msk.f32.mxu0 %vm541_vm0, %v540_v1  ;;  %431 = vmatprep.mubr.msk.f32.mxu1 %vm541_vm0, %v540_v1  ;;  %v62_v4 = vld [vmem:[%s669_s3] sm:$0xff]  ;;  %v451_v5 = vpack.c.bf16 %v60_v3, %v59_v2  ;;  %v61_v6 = vld [vmem:[#allocation6] sm:$0xff]  ;;  %v223_v12 = vld [vmem:[%s671_s5 + $0x18] sm:$0xff]  ;;  %s393_s29 = sshll.u32 %s542_s28, 4  ;;  %vm385_vm4 = vcmask 57344   ;;  %s394_s29 = int_to_ptr.vmem [resolvable:$true] %s393_s29 }
  0x28   :  { %423 = vmatpush3.msra.mxu0 %v62_v4  ;;  %v58_v7 = vld [vmem:[#allocation3] sm:$0xff]  ;;  %v221_v9 = vld [vmem:[%s671_s5 + $0x8] sm:$0xff]  ;;  %v457_v13 = vpack.c.bf16 %v223_v12, %v222_v11  ;;  %s513_s30 = scalar_lea.vmem %s394_s29, 32  ;;  %p514_p3 = scmp.lt.s32.totalorder %s394_s29, %s394_s29 }
  0x29   :  { %425 = vmatmul.mubr.msk.f32.vlgmr.msra.gmra.mrb[0].mxu0 %vm63_vm1, %v61_v6  ;;  %453 = vmatprep.subr.bf16.mxu0 %v539_v0  ;;  %v220_v8 = vld [vmem:[%s671_s5] sm:$0xff] }
  0x2a   :  { %452 = vmatpush3.bf16.msra.mxu1 %v451_v5  ;;  %442 = vmatprep.mubr.msk.f32.mxu0 %vm541_vm0, %v540_v1  ;;  %v454_v10 = vpack.c.bf16 %v221_v9, %v220_v8  ;;  %v405_v17 = vld [vmem:[%s670_s4] ss:$0 sm:$0xff] }
  0x2b   :  { %445 = vmatprep.subr.mxu1 %v540_v1  ;;  %v406_v22 = vld [vmem:[%s672_s6] ss:$0 sm:$0xff]  ;;  %s509_s6 = scalar_lea.vmem %s394_s29, 16 }
  0x2c   :  { %455 = vmatpush3.bf16.msra.mxu0 %v454_v10  ;;  %v306_v27 = vld [vmem:[%s673_s7] sm:$0x1]  ;;  %p510_p2 = scmp.ne.s32.totalorder %s394_s29, %s509_s6  ;;  %p515_p4 = scmp.lt.s32.totalorder %s513_s30, %s509_s6 }
  0x2d   :  { %432 = vmatmul.mubr.msk.f32.vlgmr.msra.gmra.mrb[0].mxu1 %vm137_vm2, %v58_v7  ;;  %456 = vmatprep.subr.bf16.mxu0 %v539_v0 }
  0x2e   :  { %447 = vmatprep.mubr.msk.f32.mxu1 %vm541_vm0, %v540_v1  ;;  %p516_p5 = por %p515_p4, %p514_p3 }
  0x30   :  { %458 = vmatpush3.bf16.msra.mxu0 %v457_v13  ;;  %p517_p6 = pnand %p516_p5, %p510_p2 }
  0xfc   :  { %v133_v14 = vpop.f32.mrb[0].mxu0 }
  0xfd   :  { %v426_v15 = vpop.f32.mrb[1].mxu0 }
 0x100   :  { %v207_v16 = vpop.f32.mrb[0].mxu1 }
 0x101   :  { %v208_v18 = vadd.f32 %v207_v16, %v133_v14  ;;  %v433_v19 = vpop.f32.mrb[1].mxu1 }
 0x103   :  { %v218_v20 = vadd.f32 %v405_v17, %v208_v18 }
 0x105   :  { %v219_v21 = vmax.f32 %v218_v20, 0.0 }
 0x107   :  { %443 = vmatmul.mubr.msk.f32.vlgmr.msra.gmra.mrb[2].mxu0 %vm231_vm3, %v219_v21 }
 0x1da   :  { %v301_v23 = vpop.f32.mrb[2].mxu0 }
 0x1db   :  { %v302_v24 = vadd.f32 %v406_v22, %v301_v23  ;;  %v444_v25 = vpop.f32.mrb[3].mxu0 }
 0x1dd   :  { %v305_v26 = vmax.f32 %v302_v24, 0.0 }
 0x1df   :  { %446 = vmatpush3.xpose.msk.msra.mxu1 %vm231_vm3, %v305_v26 }
 0x1e2   :  { %448 = vmatmul.mubr.msk.f32.vlgmr.msra.gmra.mrb[2].mxu1 %vm231_vm3, %v306_v27 }
 0x2b5   :  { %v381_v29 = vpop.f32.mrb[2].mxu1 }
 0x2b6   :  { %v382_v30 = vadd.f32 %v381_v29, %v308_v28  ;;  %v449_v31 = vpop.f32.mrb[3].mxu1 }
 0x2b8   :  { %386 = vst.msk [vmem:[#allocation8] sm:$0x1] %vm385_vm4, %v382_v30 }
 0x2b9   :  { %520 = shalt.err (!%p517_p6)
}
 0x2ba   :  { %s521_s8 = scalar_lea.hbm %s675_s9, 16 }
 0x2bb   :  { %p522_p7 = scmp.ne.s32.totalorder %s675_s9, %s521_s8  ;;  %p525_p8 = scmp.lt.u32.totalorder %s521_s8, %s675_s9 }
 0x2bd   :  { %p527_p9 = pnand %p525_p8, %p522_p7 }
 0x2bf   :  { %530 = shalt.err (!%p527_p9)
}
 0x2c0   :  { %396 = dma.vmem_to_hbm [thread:$0]  %s394_s29, 16, %s675_s9, [#allocation5]  }
 0x2c1   :  { %535 = dma.done.wait [#allocation5], 16  }
 0x2c2   :  { %536 = vsyncadd [#allocation5], 4294967280 }
 0x2c3   :  { %400 = vsyncpa [#allocation4], 1 }
 0x2c4   :  { %401 = vsyncpa [#allocation7], 1 }
 0x2c5   :  { %402 = vsyncpa [#allocation5], 1 }

</bundles_post_ra>
